<compile_context>
chip_gen: v7x
topology: tpu7x:2x2x1
jax: 0.10.0
libtpu: 0.0.40
codegen_flags: <defaults>
</compile_context>

<pallas_src>
import functools

import jax
import jax.numpy as jnp
from jax.experimental import pallas as pl
from jax.experimental.pallas import tpu as pltpu

LANE = 128
SUBLANE = 8


def _round_up(x, m):
    return ((x + m - 1) // m) * m


def _chip_generation():
    """Best-effort TPU generation (5/6/7...); 0 if unknown (CPU / interpret)."""
    try:
        kind = jax.devices()[0].device_kind.lower()
    except Exception:
        return 0
    for g in (7, 6, 5, 4):
        if f"v{g}" in kind:
            return g
    return 0


def _vmem_limit_bytes(gen):
    try:
        cap = int(pltpu.get_tpu_info().vmem_capacity_bytes)
    except Exception:
        cap = {5: 128 << 20, 6: 128 << 20, 7: 64 << 20}.get(gen, 64 << 20)
    # Leave ~16 MiB compiler headroom; never request more than 112 MiB.
    return max(32 << 20, min(cap - (16 << 20), 112 << 20))


def _block_vmem_bytes(tb, S, E2, Ddec, A, stream_item, compute_item):
    """Padded (8,128)-tiled VMEM bytes of one grid step, incl. double buffers."""
    tb8 = _round_up(tb, SUBLANE)
    enc_blk = S * tb8 * _round_up(E2, LANE) * stream_item            # (S, TB, 2E)
    dec_blk = tb8 * _round_up(Ddec, LANE) * stream_item              # (TB, Ddec)
    out_blk = tb8 * _round_up(S, LANE) * 4                           # (TB, S) f32
    inter = 2 * S * tb8 * _round_up(A, LANE) * max(compute_item, 4)  # eproj + energy
    weights = ((_round_up(Ddec, SUBLANE) + _round_up(E2, SUBLANE))
               * _round_up(A, LANE) * stream_item
               + SUBLANE * _round_up(A, LANE) * 4)
    # 2x on the pipelined blocks (double buffering), intermediates/weights once.
    return 2 * (enc_blk + dec_blk + out_blk) + inter + weights


def _pick_batch_tile(B, S, E2, Ddec, A, stream_item, compute_item, budget):
    """Largest sublane-aligned batch tile whose padded footprint fits the budget."""
    max_tb = _round_up(B, SUBLANE)
    per_row = max(
        1,
        _block_vmem_bytes(SUBLANE, S, E2, Ddec, A, stream_item, compute_item)
        // SUBLANE)
    tb = min(max_tb, max(SUBLANE, (budget // per_row // SUBLANE) * SUBLANE))
    while tb > SUBLANE and _block_vmem_bytes(
            tb, S, E2, Ddec, A, stream_item, compute_item) > budget:
        tb -= SUBLANE
    return max(SUBLANE, tb)


def attention_kernel(dec_ref, enc_ref, wd_ref, we_ref, b_ref, out_ref, *,
                     compute_dtype):
    dec = dec_ref[...]                 # (TB, Ddec)   bf16
    enc = enc_ref[...]                 # (S, TB, 2E)  bf16, PyTorch layout
    wd = wd_ref[...]                   # (Ddec, A)    bf16
    we = we_ref[...]                   # (2E, A)      bf16
    bias = b_ref[...]                  # (1, A)       f32

    s, tb, e2 = enc.shape
    a = wd.shape[1]

    # Decoder projection with bias folded in once (f32 MXU accumulate): (TB, A)
    dproj = jnp.dot(dec, wd, preferred_element_type=jnp.float32) + bias

    # Encoder projection as one tall 2D MXU matmul: (S*TB, 2E) @ (2E, A).
    # TB is always a multiple of 8, so this reshape is a free layout merge.
    eproj = jnp.dot(enc.reshape(s * tb, e2), we,
                    preferred_element_type=jnp.float32).reshape(s, tb, a)

    # energy = tanh(Linear(cat(dec, enc)))  (split-concat identity).
    # add+tanh in bf16 on v6e/v7x, f32 on v5e/unknown.
    energy = jnp.tanh(eproj.astype(compute_dtype)
                      + dproj.astype(compute_dtype)[None, :, :])       # (S, TB, A)

    # Sum over attn dim in f32, then batch-major so softmax reduces on lanes.
    attention = jnp.sum(energy.astype(jnp.float32), axis=2).T          # (TB, S)

    # Softmax over src_len (exact division so each row sums to 1).
    m = jnp.max(attention, axis=1, keepdims=True)
    e = jnp.exp(attention - m)
    out_ref[...] = (e / jnp.sum(e, axis=1, keepdims=True)).astype(out_ref.dtype)


def attention_forward(decoder_hidden, encoder_outputs, weight, bias,
                      *, enc_hid_dim, dec_hid_dim, attn_dim):
    """decoder_hidden: [B, Ddec]; encoder_outputs: [S, B, 2*E] (PyTorch layout)."""
    B, Ddec = decoder_hidden.shape
    S, Be, E2 = encoder_outputs.shape
    assert Be == B and E2 == 2 * enc_hid_dim and Ddec == dec_hid_dim
    A = attn_dim

    gen = _chip_generation()
    stream_dtype = jnp.bfloat16                        # halve the HBM-bound read
    compute_dtype = jnp.bfloat16 if gen >= 6 else jnp.float32

    # Glue on small tensors only; the big encoder tensor is cast, never transposed.
    wd = weight[:, :dec_hid_dim].T.astype(stream_dtype)     # (Ddec, A)
    we = weight[:, dec_hid_dim:].T.astype(stream_dtype)     # (2E, A)
    b = bias.reshape(1, A).astype(jnp.float32)
    dec = decoder_hidden.astype(stream_dtype)
    enc = encoder_outputs.astype(stream_dtype)

    vmem_limit = _vmem_limit_bytes(gen)
    budget = int(0.8 * vmem_limit)
    stream_item = jnp.dtype(stream_dtype).itemsize
    compute_item = jnp.dtype(compute_dtype).itemsize
    TB = _pick_batch_tile(B, S, E2, Ddec, A, stream_item, compute_item, budget)

    # v7x has 2 TensorCores: keep >= 2 grid steps (when B allows) so both work.
    if gen >= 7 and _round_up(B, SUBLANE) > SUBLANE:
        TB = min(TB, max(SUBLANE, _round_up(pl.cdiv(B, 2), SUBLANE)))

    # Pad batch so every grid step sees a full, sublane-aligned tile.
    B_pad = _round_up(B, TB)
    if B_pad != B:
        dec = jnp.pad(dec, ((0, B_pad - B), (0, 0)))
        enc = jnp.pad(enc, ((0, 0), (0, B_pad - B), (0, 0)))

    grid = (B_pad // TB,)
    kernel = functools.partial(attention_kernel, compute_dtype=compute_dtype)

    out = pl.pallas_call(
        kernel,
        out_shape=jax.ShapeDtypeStruct((B_pad, S), jnp.float32),
        grid=grid,
        in_specs=[
            pl.BlockSpec((TB, Ddec), lambda i: (i, 0)),          # decoder hidden
            pl.BlockSpec((S, TB, E2), lambda i: (0, i, 0)),      # encoder (S,B,2E)
            pl.BlockSpec((Ddec, A), lambda i: (0, 0)),           # Wd (replicated)
            pl.BlockSpec((E2, A), lambda i: (0, 0)),             # We (replicated)
            pl.BlockSpec((1, A), lambda i: (0, 0)),              # bias (replicated)
        ],
        out_specs=pl.BlockSpec((TB, S), lambda i: (i, 0)),
        compiler_params=pltpu.CompilerParams(
            dimension_semantics=("parallel",),
            vmem_limit_bytes=vmem_limit,
        ),
    )(dec, enc, wd, we, b)
    return out[:B]


def reference_forward(decoder_hidden, encoder_outputs, weight, bias):
    """Pure-JAX transcription of the PyTorch forward for verification."""
    S = encoder_outputs.shape[0]
    rep = jnp.repeat(decoder_hidden[:, None, :], S, axis=1)          # (B, S, Ddec)
    enc = jnp.transpose(encoder_outputs, (1, 0, 2))                  # (B, S, 2E)
    x = jnp.concatenate([rep, enc], axis=2)                          # (B, S, attn_in)
    energy = jnp.tanh(jnp.einsum("bsi,ai->bsa", x, weight) + bias)   # (B, S, A)
    attention = jnp.sum(energy, axis=2)                              # (B, S)
    return jax.nn.softmax(attention, axis=1)


if __name__ == "__main__":
    enc_hid_dim = 16
    dec_hid_dim = 32
    attn_dim = 32
    attn_in = enc_hid_dim * 2 + dec_hid_dim
    batch = 2
    src_len = 8

    key = jax.random.PRNGKey(0)
    k1, k2, k3, k4 = jax.random.split(key, 4)

    # PyTorch nn.Linear default init: U(-1/sqrt(fan_in), 1/sqrt(fan_in))
    bound = 1.0 / (attn_in ** 0.5)
    weight = jax.random.uniform(k1, (attn_dim, attn_in), jnp.float32, -bound, bound)
    bias = jax.random.uniform(k2, (attn_dim,), jnp.float32, -bound, bound)

    decoder_hidden = jax.random.normal(k3, (batch, dec_hid_dim), jnp.float32)
    encoder_outputs = jax.random.normal(k4, (src_len, batch, enc_hid_dim * 2),
                                        jnp.float32)

    out = attention_forward(decoder_hidden, encoder_outputs, weight, bias,
                            enc_hid_dim=enc_hid_dim, dec_hid_dim=dec_hid_dim,
                            attn_dim=attn_dim)
    out = jax.block_until_ready(out)

    ref = jax.block_until_ready(
        reference_forward(decoder_hidden, encoder_outputs, weight, bias))

    assert out.shape == (batch, src_len)
    # Tolerance absorbs the bf16 streaming (and bf16 tanh on v6e/v7x) of the
    # encoder/weights; the softmax itself is exact f32 division.
    assert jnp.allclose(out, ref, atol=2e-2, rtol=2e-2), (out, ref)
    assert jnp.allclose(jnp.sum(out, axis=1), 1.0, atol=1e-4)

    print("KERNEL_OK")
</pallas_src>

<mosaic_0001>
module attributes {stable_mosaic.version = 11 : i64} {
  func.func @attention_kernel(%arg0: i32, %arg1: memref<8x32xbf16, #tpu.memory_space<vmem>>, %arg2: memref<8x8x32xbf16, #tpu.memory_space<vmem>>, %arg3: memref<32x32xbf16, #tpu.memory_space<vmem>>, %arg4: memref<32x32xbf16, #tpu.memory_space<vmem>>, %arg5: memref<1x32xf32, #tpu.memory_space<vmem>>, %arg6: memref<8x8xf32, #tpu.memory_space<vmem>>) attributes {dimension_semantics = [#tpu.dimension_semantics<parallel>], iteration_bounds = array<i64: 1>, scalar_prefetch = 0 : i64, scratch_operands = 0 : i64, tpu.core_type = #tpu.core_type<tc>, window_params = [{transform_indices = @transform_0, window_bounds = array<i64: 8, 32>}, {transform_indices = @transform_1, window_bounds = array<i64: 8, 8, 32>}, {pipeline_mode = #tpu.pipeline_mode<synchronous>, transform_indices = @transform_2, window_bounds = array<i64: 32, 32>}, {pipeline_mode = #tpu.pipeline_mode<synchronous>, transform_indices = @transform_3, window_bounds = array<i64: 32, 32>}, {pipeline_mode = #tpu.pipeline_mode<synchronous>, transform_indices = @transform_4, window_bounds = array<i64: 1, 32>}, {transform_indices = @transform_5, window_bounds = array<i64: 8, 8>}]} {
    %c0 = arith.constant 0 : index
    %c0_0 = arith.constant 0 : index
    %0 = vector.load %arg1[%c0, %c0_0] : memref<8x32xbf16, #tpu.memory_space<vmem>>, vector<8x32xbf16>
    %c0_1 = arith.constant 0 : index
    %c0_2 = arith.constant 0 : index
    %c0_3 = arith.constant 0 : index
    %1 = vector.load %arg2[%c0_1, %c0_2, %c0_3] : memref<8x8x32xbf16, #tpu.memory_space<vmem>>, vector<8x8x32xbf16>
    %c0_4 = arith.constant 0 : index
    %c0_5 = arith.constant 0 : index
    %2 = vector.load %arg3[%c0_4, %c0_5] : memref<32x32xbf16, #tpu.memory_space<vmem>>, vector<32x32xbf16>
    %c0_6 = arith.constant 0 : index
    %c0_7 = arith.constant 0 : index
    %3 = vector.load %arg4[%c0_6, %c0_7] : memref<32x32xbf16, #tpu.memory_space<vmem>>, vector<32x32xbf16>
    %c0_8 = arith.constant 0 : index
    %c0_9 = arith.constant 0 : index
    %4 = vector.load %arg5[%c0_8, %c0_9] : memref<1x32xf32, #tpu.memory_space<vmem>>, vector<1x32xf32>
    %cst = arith.constant dense<0.000000e+00> : vector<8x32xf32>
    %5 = tpu.matmul %0, %2, %cst {dimension_numbers = #tpu.dot_dimension_numbers<[1], [0], [0], [1], [0, 0, 1, 1], [], []>} : vector<8x32xbf16>, vector<32x32xbf16>, vector<8x32xf32> -> vector<8x32xf32>
    %6 = vector.broadcast %4 : vector<1x32xf32> to vector<8x32xf32>
    %7 = arith.addf %5, %6 : vector<8x32xf32>
    %8 = vector.shape_cast %1 : vector<8x8x32xbf16> to vector<64x32xbf16>
    %cst_10 = arith.constant dense<0.000000e+00> : vector<64x32xf32>
    %9 = tpu.matmul %8, %3, %cst_10 {dimension_numbers = #tpu.dot_dimension_numbers<[1], [0], [0], [1], [0, 0, 1, 1], [], []>} : vector<64x32xbf16>, vector<32x32xbf16>, vector<64x32xf32> -> vector<64x32xf32>
    %10 = vector.shape_cast %9 : vector<64x32xf32> to vector<8x8x32xf32>
    %11 = vector.shape_cast %7 : vector<8x32xf32> to vector<1x8x32xf32>
    %12 = vector.broadcast %11 : vector<1x8x32xf32> to vector<8x8x32xf32>
    %13 = arith.addf %10, %12 : vector<8x8x32xf32>
    %14 = math.tanh %13 : vector<8x8x32xf32>
    %cst_11 = arith.constant dense<0.000000e+00> : vector<8x8xf32>
    %15 = vector.multi_reduction <add>, %14, %cst_11 [2] : vector<8x8x32xf32> to vector<8x8xf32>
    %16 = tpu.transpose %15, [1, 0] : vector<8x8xf32> -> vector<8x8xf32>
    %cst_12 = arith.constant dense<0xFF800000> : vector<8xf32>
    %17 = vector.multi_reduction <maximumf>, %16, %cst_12 [1] : vector<8x8xf32> to vector<8xf32>
    %18 = vector.shape_cast %17 : vector<8xf32> to vector<8x1xf32>
    %19 = vector.broadcast %18 : vector<8x1xf32> to vector<8x8xf32>
    %20 = arith.subf %16, %19 : vector<8x8xf32>
    %21 = math.exp %20 : vector<8x8xf32>
    %cst_13 = arith.constant dense<0.000000e+00> : vector<8xf32>
    %22 = vector.multi_reduction <add>, %21, %cst_13 [1] : vector<8x8xf32> to vector<8xf32>
    %23 = vector.shape_cast %22 : vector<8xf32> to vector<8x1xf32>
    %24 = vector.broadcast %23 : vector<8x1xf32> to vector<8x8xf32>
    %25 = arith.divf %21, %24 : vector<8x8xf32>
    %c0_14 = arith.constant 0 : index
    %c0_15 = arith.constant 0 : index
    %26 = vector.load %arg6[%c0_14, %c0_15] : memref<8x8xf32, #tpu.memory_space<vmem>>, vector<8x8xf32>
    tpu.vector_store %arg6[%c0_14, %c0_15], %25 {strides = array<i32>} : memref<8x8xf32, #tpu.memory_space<vmem>>, vector<8x8xf32>,
    return
  }
  func.func @transform_0(%arg0: i32) -> (i32, i32) {
    %c0_i32 = arith.constant 0 : i32
    %c0_i32_0 = arith.constant 0 : i32
    return %arg0, %c0_i32 : i32, i32
  }
  func.func @transform_1(%arg0: i32) -> (i32, i32, i32) {
    %c0_i32 = arith.constant 0 : i32
    %c0_i32_0 = arith.constant 0 : i32
    %c0_i32_1 = arith.constant 0 : i32
    return %c0_i32, %arg0, %c0_i32_0 : i32, i32, i32
  }
  func.func @transform_2(%arg0: i32) -> (i32, i32) {
    %c0_i32 = arith.constant 0 : i32
    %c0_i32_0 = arith.constant 0 : i32
    %c0_i32_1 = arith.constant 0 : i32
    return %c0_i32, %c0_i32_0 : i32, i32
  }
  func.func @transform_3(%arg0: i32) -> (i32, i32) {
    %c0_i32 = arith.constant 0 : i32
    %c0_i32_0 = arith.constant 0 : i32
    %c0_i32_1 = arith.constant 0 : i32
    return %c0_i32, %c0_i32_0 : i32, i32
  }
  func.func @transform_4(%arg0: i32) -> (i32, i32) {
    %c0_i32 = arith.constant 0 : i32
    %c0_i32_0 = arith.constant 0 : i32
    %c0_i32_1 = arith.constant 0 : i32
    return %c0_i32, %c0_i32_0 : i32, i32
  }
  func.func @transform_5(%arg0: i32) -> (i32, i32) {
    %c0_i32 = arith.constant 0 : i32
    %c0_i32_0 = arith.constant 0 : i32
    return %arg0, %c0_i32 : i32, i32
  }
}

</mosaic_0001>

<bundles_post_ra>
// kernel: tpu_custom_call.1
= control target key start
LH: loop header
LB: loop body
LE: loop exit
PB: predicated region body
PF: predicated region fallthrough
CT: control target
= control target key end

     0   :  { %10 = vsyncpa [#allocation3], 0  ;;  %s748_s0 = inlined_call_operand.hbm [shape: bf16[8,32], index: 0, kind: input, shape index: {}]   ;;  %s749_s1 = inlined_call_operand.hbm [shape: bf16[8,8,32], index: 1, kind: input, shape index: {}]   ;;  %s750_s2 = inlined_call_operand.hbm [shape: bf16[32,32], index: 2, kind: input, shape index: {}]   ;;  %s751_s3 = inlined_call_operand.hbm [shape: bf16[32,32], index: 3, kind: input, shape index: {}]   ;;  %s752_s4 = inlined_call_operand.vmem [shape: f32[1,32], index: 4, kind: input, shape index: {}]   ;;  %s753_s5 = inlined_call_operand.hbm [shape: f32[8,8], index: 5, kind: output, shape index: {}]  }
   0x1   :  { %11 = vsyncpa [#allocation6], 0 }
   0x2   :  { %12 = vsyncpa [#allocation9], 0 }
   0x3   :  { %13 = vsyncpa [#allocation4], 0  ;;  %s621_s18 = smov [#allocation5]   ;;  %s503_s22 = scalar_lea.hbm %s749_s1, 512 }
   0x4   :  { %s29_s19 = sshll.u32 %s621_s18, 4  ;;  %p504_p0 = scmp.ne.s32.totalorder %s749_s1, %s503_s22  ;;  %s30_s19 = int_to_ptr.vmem [resolvable:$true] %s29_s19 }
   0x5   :  { %p507_p1 = scmp.lt.u32.totalorder %s503_s22, %s749_s1 }
   0x7   :  { %p509_p2 = pnand %p507_p1, %p504_p0 }
   0x9   :  { %512 = shalt.err (!%p509_p2)
}
   0xa   :  { %s513_s27 = scalar_lea.vmem %s30_s19, 512  ;;  %p518_p4 = scmp.lt.s32.totalorder %s30_s19, %s30_s19 }
   0xb   :  { %p514_p3 = scmp.ne.s32.totalorder %s30_s19, %s513_s27  ;;  %p519_p5 = scmp.lt.s32.totalorder %s513_s27, %s513_s27 }
   0xd   :  { %p520_p6 = por %p519_p5, %p518_p4 }
   0xf   :  { %p521_p7 = pnand %p520_p6, %p514_p3 }
  0x11   :  { %524 = shalt.err (!%p521_p7)
}
  0x12   :  { %s622_s28 = smov 64   ;;  %s623_s29 = smov 4  }
  0x13   :  { %35 = dma.hbm_to_vmem [thread:$0]  %s749_s1, 512, %s30_s19, [#allocation6], %s622_s28, %s622_s28, %s623_s29  }
  0x14   :  { %s624_s7 = smov [#allocation2]   ;;  %s625_s9 = smov [#allocation7]  }
  0x15   :  { %s20_s8 = sshll.u32 %s624_s7, 4  ;;  %s41_s10 = sshll.u32 %s625_s9, 4  ;;  %s21_s8 = int_to_ptr.vmem [resolvable:$true] %s20_s8  ;;  %s42_s10 = int_to_ptr.vmem [resolvable:$true] %s41_s10 }
  0x16   :  { %s525_s13 = scalar_lea.hbm %s748_s0, 64 }
  0x17   :  { %p526_p8 = scmp.ne.s32.totalorder %s748_s0, %s525_s13  ;;  %p529_p9 = scmp.lt.u32.totalorder %s525_s13, %s748_s0 }
  0x19   :  { %p531_p10 = pnand %p529_p9, %p526_p8 }
  0x1b   :  { %534 = shalt.err (!%p531_p10)
}
  0x1c   :  { %s535_s1 = scalar_lea.vmem %s21_s8, 64  ;;  %p540_p12 = scmp.lt.s32.totalorder %s21_s8, %s21_s8 }
  0x1d   :  { %p536_p11 = scmp.ne.s32.totalorder %s21_s8, %s535_s1  ;;  %p541_p13 = scmp.lt.s32.totalorder %s535_s1, %s535_s1 }
  0x1f   :  { %p542_p0 = por %p541_p13, %p540_p12 }
  0x21   :  { %p543_p1 = pnand %p542_p0, %p536_p11 }
  0x23   :  { %546 = shalt.err (!%p543_p1)
}
  0x24   :  { %23 = dma.hbm_to_vmem [thread:$0]  %s748_s0, 64, %s21_s8, [#allocation3]  }
  0x25   :  { %s547_s22 = scalar_lea.hbm %s750_s2, 256 }
  0x26   :  { %p548_p2 = scmp.ne.s32.totalorder %s750_s2, %s547_s22  ;;  %p551_p3 = scmp.lt.u32.totalorder %s547_s22, %s750_s2 }
  0x28   :  { %p553_p4 = pnand %p551_p3, %p548_p2 }
  0x2a   :  { %556 = shalt.err (!%p553_p4)
}
  0x2b   :  { %s557_s27 = scalar_lea.vmem %s42_s10, 256  ;;  %p562_p6 = scmp.lt.s32.totalorder %s42_s10, %s42_s10 }
  0x2c   :  { %p558_p5 = scmp.ne.s32.totalorder %s42_s10, %s557_s27  ;;  %p563_p7 = scmp.lt.s32.totalorder %s557_s27, %s557_s27 }
  0x2e   :  { %p564_p8 = por %p563_p7, %p562_p6 }
  0x30   :  { %p565_p9 = pnand %p564_p8, %p558_p5 }
  0x32   :  { %568 = shalt.err (!%p565_p9)
}
  0x33   :  { %47 = dma.hbm_to_vmem [thread:$0]  %s750_s2, 256, %s42_s10, [#allocation6], %s622_s28, %s622_s28, %s623_s29  }
  0x34   :  { %s626_s6 = smov [#allocation8]   ;;  %s569_s11 = scalar_lea.hbm %s751_s3, 256 }
  0x35   :  { %s53_s7 = sshll.u32 %s626_s6, 4  ;;  %p570_p10 = scmp.ne.s32.totalorder %s751_s3, %s569_s11  ;;  %s54_s7 = int_to_ptr.vmem [resolvable:$true] %s53_s7 }
  0x36   :  { %p573_p11 = scmp.lt.u32.totalorder %s569_s11, %s751_s3 }
  0x38   :  { %p575_p12 = pnand %p573_p11, %p570_p10 }
  0x3a   :  { %578 = shalt.err (!%p575_p12)
}
  0x3b   :  { %s579_s16 = scalar_lea.vmem %s54_s7, 256  ;;  %p584_p0 = scmp.lt.s32.totalorder %s54_s7, %s54_s7 }
  0x3c   :  { %p580_p13 = scmp.ne.s32.totalorder %s54_s7, %s579_s16  ;;  %p585_p1 = scmp.lt.s32.totalorder %s579_s16, %s579_s16 }
  0x3e   :  { %p586_p2 = por %p585_p1, %p584_p0 }
  0x40   :  { %p587_p3 = pnand %p586_p2, %p580_p13 }
  0x42   :  { %590 = shalt.err (!%p587_p3)
}
  0x43   :  { %59 = dma.hbm_to_vmem [thread:$0]  %s751_s3, 256, %s54_s7, [#allocation9], %s622_s28, %s622_s28, %s623_s29  }
  0x44   :  { %613 = dma.done.wait [#allocation3], 64  }
  0x45   :  { %614 = vsyncadd [#allocation3], 4294967232 }
  0x46   :  { %615 = dma.done.wait [#allocation6], 768  }
  0x47   :  { %616 = vsyncadd [#allocation6], 4294966528 }
  0x48   :  { %617 = dma.done.wait [#allocation9], 256  }
  0x49   :  { %618 = vsyncadd [#allocation9], 4294967040  ;;  %v627_v0 = vmov 0.0   ;;  %vm628_vm0 = vmmov 0   ;;  %v475_v1 = vld [vmem:[#allocation7] sm:$0xff]   ;;  %v476_v2 = vld [vmem:[#allocation8] sm:$0xff]   ;;  %v312_v48 = vlaneseq }
  0x4a   :  { %446 = vmatprep.subr.bf16.mxu0 %v627_v0  ;;  %450 = vmatprep.mubr.msk.bf16.mxu0 %vm628_vm0, %v627_v0  ;;  %v477_v3 = vld [vmem:[#allocation7 + $0x8] sm:$0xff]   ;;  %v478_v4 = vld [vmem:[#allocation8 + $0x8] sm:$0xff]   ;;  %vm111_vm1 = vcmask 261120   ;;  %v479_v5 = vld [vmem:[#allocation5] sm:$0xff]   ;;  %vm346_vm2 = vcmask 1041409   ;;  %vm348_vm3 = vcmask 1042434  }
  0x4b   :  { %447 = vmatpush3.bf16.msra.mxu0 %v475_v1  ;;  %454 = vmatprep.subr.bf16.mxu1 %v476_v2  ;;  %v75_v6 = vld [vmem:[#allocation2] sm:$0xf]  ;;  %v480_v7 = vld [vmem:[#allocation5 + $0x8] sm:$0xff]   ;;  %v481_v8 = vld [vmem:[#allocation5 + $0x10] sm:$0xff]   ;;  %v313_v49 = vand.u32 127, %v312_v48  ;;  %v315_v50 = vshrl.u32 %v312_v48, 7 }
  0x4c   :  { %448 = vmatprep.subr.bf16.mxu0 %v627_v0  ;;  %455 = vmatpush3.bf16.msra.mxu1 %v476_v2  ;;  %v482_v9 = vld [vmem:[#allocation5 + $0x18] sm:$0xff]   ;;  %vm350_vm4 = vcmask 1043459   ;;  %vm352_vm5 = vcmask 1044484   ;;  %vm354_vm6 = vcmask 1045509   ;;  %vm356_vm7 = vcmask 1046534  }
  0x4d   :  { %456 = vmatprep.subr.bf16.mxu1 %v478_v4  ;;  %458 = vmatprep.mubr.msk.bf16.mxu1 %vm111_vm1, %v479_v5  ;;  %v423_v10 = vld [vmem:[%s752_s4] ss:$0 sm:$0xff]  ;;  %v316_v53 = vsub.s32 %v313_v49, %v315_v50  ;;  %vm358_vm8 = vcmask 1047559   ;;  %vm393_vm9 = vcmask 64512   ;;  %s629_s4 = smov [#allocation10]  }
  0x4e   :  { %s412_s29 = sshll.u32 %s629_s4, 4  ;;  %s413_s29 = int_to_ptr.vmem [resolvable:$true] %s412_s29 }
  0x4f   :  { %449 = vmatpush3.bf16.msra.mxu0 %v477_v3  ;;  %s591_s17 = scalar_lea.vmem %s413_s29, 128  ;;  %p596_p5 = scmp.lt.s32.totalorder %s413_s29, %s413_s29 }
  0x50   :  { %457 = vmatpush3.bf16.msra.mxu1 %v478_v4  ;;  %p592_p4 = scmp.ne.s32.totalorder %s413_s29, %s591_s17  ;;  %p597_p6 = scmp.lt.s32.totalorder %s591_s17, %s591_s17 }
  0x52   :  { %451 = vmatmul.mubr.msk.bf16.vlgmr.msra.gmra.mrb[0].mxu0 %vm111_vm1, %v75_v6  ;;  %p598_p7 = por %p597_p6, %p596_p5 }
  0x53   :  { %459 = vmatmul.mubr.msk.bf16.vlgmr.msra.gmra.mrb[0].mxu1 %vm111_vm1, %v480_v7 }
  0x54   :  { %462 = vmatprep.mubr.msk.bf16.mxu1 %vm111_vm1, %v481_v8  ;;  %p599_p8 = pnand %p598_p7, %p592_p4 }
  0x5b   :  { %463 = vmatmul.mubr.msk.bf16.gmra.mrb[4].mxu1 %vm111_vm1, %v482_v9 }
 0x125   :  { %v149_v11 = vpop.f32.mrb[0].mxu0 }
 0x126   :  { %v150_v12 = vadd.f32 %v423_v10, %v149_v11  ;;  %v452_v13 = vpop.f32.mrb[1].mxu0  ;;  %v460_v14 = vpop.f32.mrb[0].mxu1 }
 0x127   :  { %v152_v15 = vpop.f32.mrb[2].mxu0  ;;  %v233_v17 = vpop.f32.mrb[1].mxu1 }
 0x128   :  { %v266_v16 = vadd.f32 %v460_v14, %v150_v12  ;;  %v453_v18 = vpop.f32.mrb[3].mxu0  ;;  %v264_v19 = vadd.f32 %v233_v17, %v150_v12  ;;  %v461_v20 = vpop.f32.mrb[2].mxu1 }
 0x129   :  { %v267_v21 = vadd.f32 %v461_v20, %v150_v12  ;;  %v236_v22 = vpop.f32.mrb[3].mxu1 }
 0x12a   :  { %483 = vtanh.f32 %v266_v16  ;;  %v265_v23 = vadd.f32 %v236_v22, %v150_v12 }
 0x12b   :  { %485 = vtanh.f32 %v264_v19 }
 0x12c   :  { %487 = vtanh.f32 %v267_v21 }
 0x12d   :  { %489 = vtanh.f32 %v265_v23 }
 0x12e   :  { %v464_v24 = vpop.f32.mrb[4].mxu1 }
 0x12f   :  { %v270_v25 = vadd.f32 %v464_v24, %v150_v12  ;;  %v249_v26 = vpop.f32.mrb[5].mxu1 }
 0x130   :  { %v268_v27 = vadd.f32 %v249_v26, %v150_v12  ;;  %v465_v28 = vpop.f32.mrb[6].mxu1 }
 0x131   :  { %v271_v29 = vadd.f32 %v465_v28, %v150_v12  ;;  %v252_v30 = vpop.f32.mrb[7].mxu1 }
 0x132   :  { %491 = vtanh.f32 %v268_v27  ;;  %v269_v31 = vadd.f32 %v252_v30, %v150_v12 }
 0x133   :  { %493 = vtanh.f32 %v270_v25 }
 0x134   :  { %v484_v32 = vpop.eup %483  ;;  %495 = vtanh.f32 %v269_v31 }
 0x135   :  { %v486_v33 = vpop.eup %485  ;;  %v286_v34 = vsel %vm111_vm1, %v484_v32, 0.0  ;;  %497 = vtanh.f32 %v271_v29 }
 0x136   :  { %v488_v35 = vpop.eup %487  ;;  %287 = vadd.xlane.f32.xlu1 %v286_v34  ;;  %v280_v36 = vsel %vm111_vm1, %v486_v33, 0.0 }
 0x137   :  { %v490_v37 = vpop.eup %489  ;;  %281 = vadd.xlane.f32.xlu0 %v280_v36  ;;  %v289_v38 = vsel %vm111_vm1, %v488_v35, 0.0 }
 0x138   :  { %v283_v39 = vsel %vm111_vm1, %v490_v37, 0.0 }
 0x13a   :  { %290 = vadd.xlane.f32.xlu1 %v289_v38 }
 0x13b   :  { %284 = vadd.xlane.f32.xlu0 %v283_v39 }
 0x13c   :  { %v492_v40 = vpop.eup %491 }
 0x13d   :  { %v494_v41 = vpop.eup %493  ;;  %v292_v42 = vsel %vm111_vm1, %v492_v40, 0.0 }
 0x13e   :  { %v496_v43 = vpop.eup %495  ;;  %v298_v46 = vsel %vm111_vm1, %v494_v41, 0.0 }
 0x13f   :  { %293 = vadd.xlane.f32.xlu0 %v292_v42  ;;  %v295_v44 = vsel %vm111_vm1, %v496_v43, 0.0  ;;  %v498_v45 = vpop.eup %497 }
 0x140   :  { %296 = vadd.xlane.f32.xlu1 %v295_v44  ;;  %v301_v47 = vsel %vm111_vm1, %v498_v45, 0.0 }
 0x143   :  { %299 = vadd.xlane.f32.xlu0 %v298_v46 }
 0x144   :  { %302 = vadd.xlane.f32.xlu1 %v301_v47 }
 0x1c3   :  { %v288_v51 = vpop.xlane.xlu1 %287 }
 0x1c4   :  { %v282_v52 = vpop.xlane.xlu0 %281  ;;  %v325_v58 = vrot.slane %v288_v51, %v316_v53 }
 0x1c5   :  { %v317_v56 = vrot.slane %v282_v52, %v316_v53 }
 0x1c7   :  { %v291_v54 = vpop.xlane.xlu1 %290 }
 0x1c8   :  { %v285_v55 = vpop.xlane.xlu0 %284  ;;  %v329_v59 = vrot.slane %v291_v54, %v316_v53 }
 0x1c9   :  { %v321_v57 = vrot.slane %v285_v55, %v316_v53 }
 0x1cb   :  { %v347_v60 = vsel %vm346_vm2, %v321_v57, %v317_v56 }
 0x1cc   :  { %v349_v61 = vsel %vm348_vm3, %v325_v58, %v347_v60  ;;  %v294_v62 = vpop.xlane.xlu0 %293 }
 0x1cd   :  { %v351_v63 = vsel %vm350_vm4, %v329_v59, %v349_v61  ;;  %v333_v0 = vrot.slane %v294_v62, %v316_v53  ;;  %v297_v1 = vpop.xlane.xlu1 %296 }
 0x1ce   :  { %v337_v3 = vrot.slane %v297_v1, %v316_v53 }
 0x1cf   :  { %v353_v2 = vsel %vm352_vm5, %v333_v0, %v351_v63 }
 0x1d0   :  { %v300_v4 = vpop.xlane.xlu0 %299  ;;  %v355_v6 = vsel %vm354_vm6, %v337_v3, %v353_v2 }
 0x1d1   :  { %v341_v5 = vrot.slane %v300_v4, %v316_v53  ;;  %v303_v7 = vpop.xlane.xlu1 %302 }
 0x1d2   :  { %v345_v8 = vrot.slane %v303_v7, %v316_v53 }
 0x1d3   :  { %v357_v9 = vsel %vm356_vm7, %v341_v5, %v355_v6 }
 0x1d4   :  { %v359_v10 = vsel %vm358_vm8, %v345_v8, %v357_v9 }
 0x1d5   :  { %361 = vxpose.xlu0.b32.start.end [1/1] (short) (narrow) %v359_v10, 8 }
 0x255   :  { %v377_v11 = vpop.trf.xlu0 }
 0x256   :  { %v394_v12 = vsel %vm393_vm9, %v377_v11, -inf }
 0x257   :  { %395 = vmax.xlane.f32.xlu1 %v394_v12 }
 0x2e4   :  { %v396_v13 = vpop.xlane.xlu1 %395 }
 0x2e5   :  { %v397_v14 = vsub.f32 %v377_v11, %v396_v13 }
 0x2e7   :  { %v398_v15 = vmul.f32 1.442695, %v397_v14 }
 0x2e9   :  { %499 = vpow2.f32 %v398_v15 }
 0x2f3   :  { %v500_v16 = vpop.eup %499 }
 0x2f4   :  { %v400_v17 = vsel %vm393_vm9, %v500_v16, 0.0 }
 0x2f5   :  { %401 = vadd.xlane.f32.xlu1 %v400_v17 }
 0x382   :  { %v402_v18 = vpop.xlane.xlu1 %401 }
 0x383   :  { %501 = vrcp.f32 %v402_v18 }
 0x38d   :  { %v502_v19 = vpop.eup %501 }
 0x38e   :  { %v404_v20 = vmul.f32 %v502_v19, %v500_v16 }
 0x390   :  { %405 = vst.msk [vmem:[#allocation10] sm:$0xff] %vm393_vm9, %v404_v20 }
 0x391   :  { %602 = shalt.err (!%p599_p8)
}
 0x392   :  { %s603_s19 = scalar_lea.hbm %s753_s5, 128 }
 0x393   :  { %p604_p9 = scmp.ne.s32.totalorder %s753_s5, %s603_s19  ;;  %p607_p10 = scmp.lt.u32.totalorder %s603_s19, %s753_s5 }
 0x395   :  { %p609_p11 = pnand %p607_p10, %p604_p9 }
 0x397   :  { %612 = shalt.err (!%p609_p11)
}
 0x398   :  { %415 = dma.vmem_to_hbm [thread:$0]  %s413_s29, 128, %s753_s5, [#allocation4]  }
 0x399   :  { %619 = dma.done.wait [#allocation4], 128  }
 0x39a   :  { %620 = vsyncadd [#allocation4], 4294967168 }
 0x39b   :  { %419 = vsyncpa [#allocation3], 1 }
 0x39c   :  { %420 = vsyncpa [#allocation6], 1 }
 0x39d   :  { %421 = vsyncpa [#allocation9], 1 }
 0x39e   :  { %422 = vsyncpa [#allocation4], 1 }

</bundles_post_ra>
